<compile_context>
chip_gen: v7x
topology: tpu7x:2x2x1
jax: 0.10.0
libtpu: 0.0.40
codegen_flags: <defaults>
</compile_context>

<pallas_src>
import math
import functools

import jax
import jax.numpy as jnp
from jax import lax
from jax.experimental import pallas as pl
from jax.experimental.pallas import tpu as pltpu

_MXU_DTYPE = jnp.bfloat16            # matmul-input dtype; f32 accumulate
_VMEM_LIMIT = 64 * 1024 * 1024       # explicit scoped-VMEM budget for fused blocks


def _tile(dim, pref, align):
    """Largest multiple of `align` that divides `dim` and is <= `pref`.

    Falls back to the full dim only when no aligned divisor exists (keeps the
    (8,128) block constraint satisfiable); never exceeds the array extent."""
    if dim <= pref:
        return dim
    best = None
    t = align
    while t <= pref:
        if dim % t == 0:
            best = t
        t += align
    return best if best is not None else dim


def _ln(x, g, b, eps=1e-5):
    # x: (M, D) f32; g, b: (1, D) f32.  torch LayerNorm default eps.
    mean = jnp.mean(x, axis=-1, keepdims=True)
    var = jnp.mean(jnp.square(x - mean), axis=-1, keepdims=True)
    return (x - mean) * lax.rsqrt(var + eps) * g + b


def _mm(a, w_bf16):
    # (M, K) activation (cast to bf16) @ (K, N) bf16 weight -> f32 (MXU, f32 acc)
    return lax.dot_general(a.astype(_MXU_DTYPE), w_bf16,
                           (((1,), (0,)), ((), ())),
                           preferred_element_type=jnp.float32)


def _bmm(a, b, contract):
    # head-batched matmul: batch dim 0 on both operands, single contracting dim each
    return lax.dot_general(a.astype(_MXU_DTYPE), b.astype(_MXU_DTYPE),
                           (((contract[0],), (contract[1],)), ((0,), (0,))),
                           preferred_element_type=jnp.float32)


# ------------------------- tiled linear (MXU, K-grid, output-resident accumulator) -------

def _linear_kernel(x_ref, w_ref, b_ref, o_ref):
    # Output block index is constant along the k axis, so o_ref stays resident in VMEM
    # and doubles as the f32 accumulator (no scratch, no final copy).
    @pl.when(pl.program_id(2) == 0)
    def _():
        o_ref[...] = jnp.broadcast_to(b_ref[...], o_ref.shape)

    o_ref[...] += lax.dot_general(x_ref[...].astype(_MXU_DTYPE), w_ref[...],
                                  (((1,), (0,)), ((), ())),
                                  preferred_element_type=jnp.float32)


def linear(x, w, b, *, tm=256, tn=512, tk=512):
    """y = x @ w + b for x of shape (..., K); w is (K, N) bf16, b is (N,) f32."""
    if w.dtype != _MXU_DTYPE:
        w = w.astype(_MXU_DTYPE)
    *lead, K = x.shape
    M = math.prod(lead) if lead else 1
    N = w.shape[1]
    tm = _tile(M, tm, 8)
    tn = _tile(N, tn, 128)
    tk = _tile(K, tk, 128)
    grid = (M // tm, N // tn, K // tk)
    cost = pl.CostEstimate(flops=2 * M * N * K, transcendentals=0,
                           bytes_accessed=4 * M * K + 2 * K * N + 4 * M * N)
    out = pl.pallas_call(
        _linear_kernel,
        out_shape=jax.ShapeDtypeStruct((M, N), jnp.float32),
        grid=grid,
        in_specs=[pl.BlockSpec((tm, tk), lambda i, j, k: (i, k)),
                  pl.BlockSpec((tk, tn), lambda i, j, k: (k, j)),
                  pl.BlockSpec((1, tn), lambda i, j, k: (0, j))],
        out_specs=pl.BlockSpec((tm, tn), lambda i, j, k: (i, j)),
        compiler_params=pltpu.CompilerParams(
            dimension_semantics=("parallel", "parallel", "arbitrary"),
            vmem_limit_bytes=_VMEM_LIMIT),
        cost_estimate=cost,
    )(x.reshape(M, K), w, b.reshape(1, N))
    return out.reshape(*lead, N)


# --------------------------------- standalone layernorm ----------------------------------

def _layernorm_kernel(x_ref, g_ref, b_ref, o_ref):
    x = x_ref[...].astype(jnp.float32)
    o_ref[...] = _ln(x, g_ref[...], b_ref[...]).astype(o_ref.dtype)


def layernorm(x, g, b):
    *lead, D = x.shape
    M = math.prod(lead) if lead else 1
    tm = _tile(M, 512, 8)
    out = pl.pallas_call(
        _layernorm_kernel,
        out_shape=jax.ShapeDtypeStruct((M, D), jnp.float32),
        grid=(M // tm,),
        in_specs=[pl.BlockSpec((tm, D), lambda i: (i, 0)),
                  pl.BlockSpec((1, D), lambda i: (0, 0)),
                  pl.BlockSpec((1, D), lambda i: (0, 0))],
        out_specs=pl.BlockSpec((tm, D), lambda i: (i, 0)),
        compiler_params=pltpu.CompilerParams(dimension_semantics=("parallel",)),
    )(x.reshape(M, D), g.reshape(1, D), b.reshape(1, D))
    return out.reshape(*lead, D)


# ------------------------- fused patch embedding (LN -> Linear -> LN -> +pos) -------------

def _patch_embed_kernel(p_ref, g1_ref, b1_ref, w_ref, bw_ref, g2_ref, b2_ref, pos_ref, o_ref):
    p = p_ref[0].astype(jnp.float32)                       # (NP, patch_dim)
    h = _ln(p, g1_ref[...], b1_ref[...])
    t = _mm(h, w_ref[...]) + bw_ref[...]
    t = _ln(t, g2_ref[...], b2_ref[...])
    o_ref[0] = (t + pos_ref[0]).astype(o_ref.dtype)


def patch_embed(patches, params):
    B, NP, PD = patches.shape
    D = params['patch_w'].shape[1]
    const2 = lambda b: (0, 0)
    return pl.pallas_call(
        _patch_embed_kernel,
        out_shape=jax.ShapeDtypeStruct((B, NP, D), jnp.float32),
        grid=(B,),
        in_specs=[pl.BlockSpec((1, NP, PD), lambda b: (b, 0, 0)),
                  pl.BlockSpec((1, PD), const2),
                  pl.BlockSpec((1, PD), const2),
                  pl.BlockSpec((PD, D), const2),
                  pl.BlockSpec((1, D), const2),
                  pl.BlockSpec((1, D), const2),
                  pl.BlockSpec((1, D), const2),
                  pl.BlockSpec((1, NP, D), lambda b: (0, 0, 0))],
        out_specs=pl.BlockSpec((1, NP, D), lambda b: (b, 0, 0)),
        compiler_params=pltpu.CompilerParams(dimension_semantics=("parallel",),
                                             vmem_limit_bytes=_VMEM_LIMIT),
    )(patches,
      params['patch_ln1_g'].reshape(1, PD), params['patch_ln1_b'].reshape(1, PD),
      params['patch_w'], params['patch_b'].reshape(1, D),
      params['patch_ln2_g'].reshape(1, D), params['patch_ln2_b'].reshape(1, D),
      params['pos_embedding'])


# ---------------- fused transformer layer: LN->attn->+res->LN->FFN->+res (one call) -------

def _layer_kernel(x_ref, ag_ref, ab_ref, wqkv_ref, wout_ref, bout_ref,
                  fg_ref, fb_ref, w1_ref, b1_ref, w2_ref, b2_ref, o_ref,
                  *, heads, dim_head, scale):
    x = x_ref[0].astype(jnp.float32)                       # (N, D)
    dh = dim_head

    # --- attention: LN -> qkv -> batched-head SDPA -> single out-proj -> residual
    h = _ln(x, ag_ref[...], ab_ref[...])
    qkv = _mm(h, wqkv_ref[...])                            # (N, 3*heads*dh), to_qkv has no bias

    # One-time relayout into a head-major (3*heads, N, dh) stack; every matmul below is
    # a single head-batched dot_general (no per-head MXU calls / per-head accumulates).
    qkv_h = jnp.stack([qkv[:, i * dh:(i + 1) * dh] for i in range(3 * heads)], axis=0)
    q = qkv_h[0 * heads:1 * heads]                         # (heads, N, dh)
    k = qkv_h[1 * heads:2 * heads]
    v = qkv_h[2 * heads:3 * heads]

    s = _bmm(q, k, contract=(2, 2)) * scale                # (heads, N, N)
    s = s - jnp.max(s, axis=-1, keepdims=True)
    p = jnp.exp(s)
    p = p * pl.reciprocal(jnp.sum(p, axis=-1, keepdims=True), approx=True)
    oh = _bmm(p, v, contract=(2, 1))                       # (heads, N, dh)

    # merge heads back to (N, heads*dh) and run ONE full-K output projection.
    o_cat = jnp.concatenate([oh[hh] for hh in range(heads)], axis=-1)
    attn = _mm(o_cat, wout_ref[...]) + bout_ref[...]
    x = x + attn

    # --- feed-forward: LN -> ff1 -> GELU -> ff2 -> residual
    h = _ln(x, fg_ref[...], fb_ref[...])
    h1 = _mm(h, w1_ref[...]) + b1_ref[...]
    # TODO(synk): torch nn.GELU() is the exact erf form; tanh approximation used here
    # (runs on the otherwise-idle EUP slot).
    h1 = jax.nn.gelu(h1, approximate=True)
    h2 = _mm(h1, w2_ref[...]) + b2_ref[...]
    o_ref[0] = (x + h2).astype(o_ref.dtype)


def transformer_layer(x, layer, heads, dim_head):
    B, N, D = x.shape
    inner = heads * dim_head
    Hm = layer['w_ff1'].shape[1]
    scale = dim_head ** -0.5
    const2 = lambda b: (0, 0)
    kernel = functools.partial(_layer_kernel, heads=heads, dim_head=dim_head, scale=scale)
    return pl.pallas_call(
        kernel,
        out_shape=jax.ShapeDtypeStruct((B, N, D), jnp.float32),
        grid=(B,),
        in_specs=[pl.BlockSpec((1, N, D), lambda b: (b, 0, 0)),
                  pl.BlockSpec((1, D), const2), pl.BlockSpec((1, D), const2),
                  pl.BlockSpec((D, 3 * inner), const2),
                  pl.BlockSpec((inner, D), const2),
                  pl.BlockSpec((1, D), const2),
                  pl.BlockSpec((1, D), const2), pl.BlockSpec((1, D), const2),
                  pl.BlockSpec((D, Hm), const2), pl.BlockSpec((1, Hm), const2),
                  pl.BlockSpec((Hm, D), const2), pl.BlockSpec((1, D), const2)],
        out_specs=pl.BlockSpec((1, N, D), lambda b: (b, 0, 0)),
        compiler_params=pltpu.CompilerParams(dimension_semantics=("parallel",),
                                             vmem_limit_bytes=_VMEM_LIMIT),
    )(x,
      layer['attn_ln_g'].reshape(1, D), layer['attn_ln_b'].reshape(1, D),
      layer['w_qkv'], layer['w_out'], layer['b_out'].reshape(1, D),
      layer['ff_ln_g'].reshape(1, D), layer['ff_ln_b'].reshape(1, D),
      layer['w_ff1'], layer['b_ff1'].reshape(1, Hm),
      layer['w_ff2'], layer['b_ff2'].reshape(1, D))


# ------------------------------------- MSE loss (gridded reduction) -----------------------

def _mse_kernel(p_ref, t_ref, o_ref, acc_ref, *, denom):
    @pl.when(pl.program_id(0) == 0)
    def _():
        acc_ref[...] = jnp.zeros_like(acc_ref)

    d = p_ref[...].astype(jnp.float32) - t_ref[...].astype(jnp.float32)
    s = jnp.sum(d * d, axis=1, keepdims=True)        # (tm, 1)  lane reduce
    acc_ref[...] += jnp.sum(s, axis=0, keepdims=True)  # (1, 1)  sublane reduce

    @pl.when(pl.program_id(0) == pl.num_programs(0) - 1)
    def _():
        o_ref[...] = acc_ref[...] * (1.0 / denom)


def mse_loss(pred, target):
    M = math.prod(pred.shape[:-1])
    D = pred.shape[-1]
    tm = _tile(M, 512, 8)
    out = pl.pallas_call(
        functools.partial(_mse_kernel, denom=float(M * D)),
        out_shape=jax.ShapeDtypeStruct((1, 1), jnp.float32),
        grid=(M // tm,),
        in_specs=[pl.BlockSpec((tm, D), lambda i: (i, 0)),
                  pl.BlockSpec((tm, D), lambda i: (i, 0))],
        out_specs=pl.BlockSpec((1, 1), lambda i: (0, 0)),
        scratch_shapes=[pltpu.VMEM((1, 1), jnp.float32)],
        compiler_params=pltpu.CompilerParams(dimension_semantics=("arbitrary",)),
    )(pred.reshape(M, D), target.reshape(M, D))
    return out[0, 0]


# --------------------------------- parameter building -------------------------------------

def _init_linear(key, fan_in, fan_out):
    kw, kb = jax.random.split(key)
    bound = 1.0 / math.sqrt(fan_in)            # PyTorch nn.Linear default init range
    w = jax.random.uniform(kw, (fan_in, fan_out), jnp.float32, -bound, bound)
    b = jax.random.uniform(kb, (fan_out,), jnp.float32, -bound, bound)
    return w, b


def init_transformer(key, dim, depth, heads, dim_head, mlp_dim):
    inner = heads * dim_head
    layers = []
    for _ in range(depth):
        key, k1, k2, k3, k4 = jax.random.split(key, 5)
        w_qkv, _ = _init_linear(k1, dim, inner * 3)          # to_qkv: bias=False
        w_out, b_out = _init_linear(k2, inner, dim)
        w_ff1, b_ff1 = _init_linear(k3, dim, mlp_dim)
        w_ff2, b_ff2 = _init_linear(k4, mlp_dim, dim)
        layers.append(dict(
            attn_ln_g=jnp.ones((dim,), jnp.float32), attn_ln_b=jnp.zeros((dim,), jnp.float32),
            # weights pre-cast to bf16 once in HBM (f32 accumulate inside kernels)
            w_qkv=w_qkv.astype(_MXU_DTYPE), w_out=w_out.astype(_MXU_DTYPE), b_out=b_out,
            ff_ln_g=jnp.ones((dim,), jnp.float32), ff_ln_b=jnp.zeros((dim,), jnp.float32),
            w_ff1=w_ff1.astype(_MXU_DTYPE), b_ff1=b_ff1,
            w_ff2=w_ff2.astype(_MXU_DTYPE), b_ff2=b_ff2,
        ))
    return dict(layers=layers, heads=heads, dim_head=dim_head,
                final_ln_g=jnp.ones((dim,), jnp.float32),
                final_ln_b=jnp.zeros((dim,), jnp.float32))


def transformer_apply(x, params):
    heads, dim_head = params['heads'], params['dim_head']
    for layer in params['layers']:
        # one fused pallas_call per layer: LN -> attn -> +res -> LN -> FFN -> +res
        x = transformer_layer(x, layer, heads, dim_head)
    return layernorm(x, params['final_ln_g'], params['final_ln_b'])


def init_mae(key, *, image_size, patch_size, channels, encoder_dim, decoder_dim,
             enc_depth, enc_heads, enc_dim_head,
             dec_depth, dec_heads, dec_dim_head, masking_ratio):
    num_patches = (image_size // patch_size) ** 2
    patch_dim = channels * patch_size * patch_size       # == pixel_values_per_patch
    keys = jax.random.split(key, 8)
    params = dict(
        pos_embedding=0.02 * jax.random.normal(keys[0], (1, num_patches, encoder_dim), jnp.float32),
        patch_ln1_g=jnp.ones((patch_dim,), jnp.float32), patch_ln1_b=jnp.zeros((patch_dim,), jnp.float32),
        patch_ln2_g=jnp.ones((encoder_dim,), jnp.float32), patch_ln2_b=jnp.zeros((encoder_dim,), jnp.float32),
        mask_token=jax.random.normal(keys[4], (decoder_dim,), jnp.float32),
        decoder_pos_emb=jax.random.normal(keys[6], (num_patches, decoder_dim), jnp.float32),
    )
    pw, pb = _init_linear(keys[1], patch_dim, encoder_dim)
    params['patch_w'], params['patch_b'] = pw.astype(_MXU_DTYPE), pb
    params['enc_transformer'] = init_transformer(keys[2], encoder_dim, enc_depth, enc_heads,
                                                 enc_dim_head, encoder_dim * 4)
    ew, eb = _init_linear(keys[3], encoder_dim, decoder_dim)
    params['enc_to_dec_w'], params['enc_to_dec_b'] = ew.astype(_MXU_DTYPE), eb
    params['decoder'] = init_transformer(keys[5], decoder_dim, dec_depth, dec_heads,
                                         dec_dim_head, decoder_dim * 4)
    tw, tb = _init_linear(keys[7], decoder_dim, patch_dim)
    params['to_pixels_w'], params['to_pixels_b'] = tw.astype(_MXU_DTYPE), tb
    hp = dict(patch_size=patch_size, num_patches=num_patches, patch_dim=patch_dim,
              masking_ratio=masking_ratio, decoder_dim=decoder_dim)
    return params, hp


# --------------------------------------- MAE forward --------------------------------------

def patchify(img, p):
    # NCHW -> (B, (H/p)*(W/p), p*p*C), matching 'b c (h p1) (w p2) -> b (h w) (p1 p2 c)'
    B, C, H, W = img.shape
    x = img.reshape(B, C, H // p, p, W // p, p)
    x = x.transpose(0, 2, 4, 3, 5, 1)
    return x.reshape(B, (H // p) * (W // p), p * p * C)


def mae_forward(params, hp, img, mask_key):
    patches = patchify(img, hp['patch_size'])                 # (B, NP, patch_dim)
    B, num_patches, _ = patches.shape

    # fused patch_to_emb (LayerNorm -> Linear -> LayerNorm) + pos embedding (pool == 'mean')
    tokens = patch_embed(patches, params)                     # (B, NP, enc_dim)

    # random masking (torch.rand().argsort equivalent) — data-dependent gather: JAX glue
    num_masked = int(hp['masking_ratio'] * num_patches)
    rand = jax.random.uniform(mask_key, (B, num_patches))
    rand_indices = jnp.argsort(rand, axis=-1)
    masked_indices = rand_indices[:, :num_masked]
    unmasked_indices = rand_indices[:, num_masked:]
    batch_range = jnp.arange(B)[:, None]
    tokens = tokens[batch_range, unmasked_indices]            # (B, NU, enc_dim)
    masked_patches = patches[batch_range, masked_indices]     # (B, NM, patch_dim)

    # encoder transformer on unmasked tokens
    encoded = transformer_apply(tokens, params['enc_transformer'])
    decoder_tokens = linear(encoded, params['enc_to_dec_w'], params['enc_to_dec_b'])

    # add decoder positional embeddings, build the full (scattered) decoder sequence
    unmasked_decoder_tokens = decoder_tokens + params['decoder_pos_emb'][unmasked_indices]
    mask_tokens = jnp.broadcast_to(params['mask_token'], (B, num_masked, hp['decoder_dim']))
    mask_tokens = mask_tokens + params['decoder_pos_emb'][masked_indices]
    full = jnp.zeros((B, num_patches, hp['decoder_dim']), jnp.float32)
    full = full.at[batch_range, unmasked_indices].set(unmasked_decoder_tokens)
    full = full.at[batch_range, masked_indices].set(mask_tokens)

    # decoder transformer, project masked positions back to pixels, MSE loss
    decoded = transformer_apply(full, params['decoder'])
    mask_tokens_out = decoded[batch_range, masked_indices]
    pred_pixel_values = linear(mask_tokens_out, params['to_pixels_w'], params['to_pixels_b'])
    return mse_loss(pred_pixel_values, masked_patches)


if __name__ == "__main__":
    key = jax.random.PRNGKey(0)
    k_param, k_img, k_mask = jax.random.split(key, 3)

    # small shapes: 16x16 RGB image, 4x4 patches -> 16 patches of dim 48
    params, hp = init_mae(
        k_param, image_size=16, patch_size=4, channels=3,
        encoder_dim=32, decoder_dim=16,
        enc_depth=1, enc_heads=2, enc_dim_head=8,
        dec_depth=1, dec_heads=2, dec_dim_head=8,
        masking_ratio=0.75)

    img = jax.random.normal(k_img, (2, 3, 16, 16), jnp.float32)
    loss = mae_forward(params, hp, img, k_mask)
    jax.block_until_ready(loss)
    print("KERNEL_OK")
</pallas_src>

<mosaic_0001>
module attributes {stable_mosaic.version = 11 : i64} {
  func.func @_patch_embed_kernel(%arg0: i32, %arg1: memref<1x16x48xf32, #tpu.memory_space<vmem>>, %arg2: memref<1x48xf32, #tpu.memory_space<vmem>>, %arg3: memref<1x48xf32, #tpu.memory_space<vmem>>, %arg4: memref<48x32xbf16, #tpu.memory_space<vmem>>, %arg5: memref<1x32xf32, #tpu.memory_space<vmem>>, %arg6: memref<1x32xf32, #tpu.memory_space<vmem>>, %arg7: memref<1x32xf32, #tpu.memory_space<vmem>>, %arg8: memref<1x16x32xf32, #tpu.memory_space<vmem>>, %arg9: memref<1x16x32xf32, #tpu.memory_space<vmem>>) attributes {dimension_semantics = [#tpu.dimension_semantics<parallel>], iteration_bounds = array<i64: 2>, scalar_prefetch = 0 : i64, scratch_operands = 0 : i64, tpu.core_type = #tpu.core_type<tc>, window_params = [{transform_indices = @transform_0, window_bounds = array<i64: 1, 16, 48>}, {pipeline_mode = #tpu.pipeline_mode<synchronous>, transform_indices = @transform_1, window_bounds = array<i64: 1, 48>}, {pipeline_mode = #tpu.pipeline_mode<synchronous>, transform_indices = @transform_2, window_bounds = array<i64: 1, 48>}, {pipeline_mode = #tpu.pipeline_mode<synchronous>, transform_indices = @transform_3, window_bounds = array<i64: 48, 32>}, {pipeline_mode = #tpu.pipeline_mode<synchronous>, transform_indices = @transform_4, window_bounds = array<i64: 1, 32>}, {pipeline_mode = #tpu.pipeline_mode<synchronous>, transform_indices = @transform_5, window_bounds = array<i64: 1, 32>}, {pipeline_mode = #tpu.pipeline_mode<synchronous>, transform_indices = @transform_6, window_bounds = array<i64: 1, 32>}, {pipeline_mode = #tpu.pipeline_mode<synchronous>, transform_indices = @transform_7, window_bounds = array<i64: 1, 16, 32>}, {transform_indices = @transform_8, window_bounds = array<i64: 1, 16, 32>}]} {
    %c0 = arith.constant 0 : index
    %c0_0 = arith.constant 0 : index
    %c0_1 = arith.constant 0 : index
    %0 = vector.load %arg1[%c0, %c0_0, %c0_1] : memref<1x16x48xf32, #tpu.memory_space<vmem>>, vector<1x16x48xf32>
    %1 = vector.shape_cast %0 : vector<1x16x48xf32> to vector<16x48xf32>
    %c0_2 = arith.constant 0 : index
    %c0_3 = arith.constant 0 : index
    %2 = vector.load %arg2[%c0_2, %c0_3] : memref<1x48xf32, #tpu.memory_space<vmem>>, vector<1x48xf32>
    %c0_4 = arith.constant 0 : index
    %c0_5 = arith.constant 0 : index
    %3 = vector.load %arg3[%c0_4, %c0_5] : memref<1x48xf32, #tpu.memory_space<vmem>>, vector<1x48xf32>
    %cst = arith.constant dense<0.000000e+00> : vector<16xf32>
    %4 = vector.multi_reduction <add>, %1, %cst [1] : vector<16x48xf32> to vector<16xf32>
    %5 = vector.shape_cast %4 : vector<16xf32> to vector<16x1xf32>
    %cst_6 = arith.constant 4.800000e+01 : f32
    %6 = vector.broadcast %cst_6 : f32 to vector<16x1xf32>
    %7 = arith.divf %5, %6 : vector<16x1xf32>
    %8 = vector.broadcast %7 : vector<16x1xf32> to vector<16x48xf32>
    %9 = arith.subf %1, %8 : vector<16x48xf32>
    %10 = arith.mulf %9, %9 : vector<16x48xf32>
    %cst_7 = arith.constant dense<0.000000e+00> : vector<16xf32>
    %11 = vector.multi_reduction <add>, %10, %cst_7 [1] : vector<16x48xf32> to vector<16xf32>
    %12 = vector.shape_cast %11 : vector<16xf32> to vector<16x1xf32>
    %cst_8 = arith.constant 4.800000e+01 : f32
    %13 = vector.broadcast %cst_8 : f32 to vector<16x1xf32>
    %14 = arith.divf %12, %13 : vector<16x1xf32>
    %15 = vector.broadcast %7 : vector<16x1xf32> to vector<16x48xf32>
    %16 = arith.subf %1, %15 : vector<16x48xf32>
    %cst_9 = arith.constant 9.99999974E-6 : f32
    %17 = vector.broadcast %cst_9 : f32 to vector<16x1xf32>
    %18 = arith.addf %14, %17 : vector<16x1xf32>
    %19 = math.rsqrt %18 : vector<16x1xf32>
    %20 = vector.broadcast %19 : vector<16x1xf32> to vector<16x48xf32>
    %21 = arith.mulf %16, %20 : vector<16x48xf32>
    %22 = vector.broadcast %2 : vector<1x48xf32> to vector<16x48xf32>
    %23 = arith.mulf %21, %22 : vector<16x48xf32>
    %24 = vector.broadcast %3 : vector<1x48xf32> to vector<16x48xf32>
    %25 = arith.addf %23, %24 : vector<16x48xf32>
    %c0_10 = arith.constant 0 : index
    %c0_11 = arith.constant 0 : index
    %26 = vector.load %arg4[%c0_10, %c0_11] : memref<48x32xbf16, #tpu.memory_space<vmem>>, vector<48x32xbf16>
    %27 = arith.truncf %25 : vector<16x48xf32> to vector<16x48xbf16>
    %cst_12 = arith.constant dense<0.000000e+00> : vector<16x32xf32>
    %28 = tpu.matmul %27, %26, %cst_12 {dimension_numbers = #tpu.dot_dimension_numbers<[1], [0], [0], [1], [0, 0, 1, 1], [], []>} : vector<16x48xbf16>, vector<48x32xbf16>, vector<16x32xf32> -> vector<16x32xf32>
    %c0_13 = arith.constant 0 : index
    %c0_14 = arith.constant 0 : index
    %29 = vector.load %arg5[%c0_13, %c0_14] : memref<1x32xf32, #tpu.memory_space<vmem>>, vector<1x32xf32>
    %30 = vector.broadcast %29 : vector<1x32xf32> to vector<16x32xf32>
    %31 = arith.addf %28, %30 : vector<16x32xf32>
    %c0_15 = arith.constant 0 : index
    %c0_16 = arith.constant 0 : index
    %32 = vector.load %arg6[%c0_15, %c0_16] : memref<1x32xf32, #tpu.memory_space<vmem>>, vector<1x32xf32>
    %c0_17 = arith.constant 0 : index
    %c0_18 = arith.constant 0 : index
    %33 = vector.load %arg7[%c0_17, %c0_18] : memref<1x32xf32, #tpu.memory_space<vmem>>, vector<1x32xf32>
    %cst_19 = arith.constant dense<0.000000e+00> : vector<16xf32>
    %34 = vector.multi_reduction <add>, %31, %cst_19 [1] : vector<16x32xf32> to vector<16xf32>
    %35 = vector.shape_cast %34 : vector<16xf32> to vector<16x1xf32>
    %cst_20 = arith.constant 3.200000e+01 : f32
    %36 = vector.broadcast %cst_20 : f32 to vector<16x1xf32>
    %37 = arith.divf %35, %36 : vector<16x1xf32>
    %38 = vector.broadcast %37 : vector<16x1xf32> to vector<16x32xf32>
    %39 = arith.subf %31, %38 : vector<16x32xf32>
    %40 = arith.mulf %39, %39 : vector<16x32xf32>
    %cst_21 = arith.constant dense<0.000000e+00> : vector<16xf32>
    %41 = vector.multi_reduction <add>, %40, %cst_21 [1] : vector<16x32xf32> to vector<16xf32>
    %42 = vector.shape_cast %41 : vector<16xf32> to vector<16x1xf32>
    %cst_22 = arith.constant 3.200000e+01 : f32
    %43 = vector.broadcast %cst_22 : f32 to vector<16x1xf32>
    %44 = arith.divf %42, %43 : vector<16x1xf32>
    %45 = vector.broadcast %37 : vector<16x1xf32> to vector<16x32xf32>
    %46 = arith.subf %31, %45 : vector<16x32xf32>
    %cst_23 = arith.constant 9.99999974E-6 : f32
    %47 = vector.broadcast %cst_23 : f32 to vector<16x1xf32>
    %48 = arith.addf %44, %47 : vector<16x1xf32>
    %49 = math.rsqrt %48 : vector<16x1xf32>
    %50 = vector.broadcast %49 : vector<16x1xf32> to vector<16x32xf32>
    %51 = arith.mulf %46, %50 : vector<16x32xf32>
    %52 = vector.broadcast %32 : vector<1x32xf32> to vector<16x32xf32>
    %53 = arith.mulf %51, %52 : vector<16x32xf32>
    %54 = vector.broadcast %33 : vector<1x32xf32> to vector<16x32xf32>
    %55 = arith.addf %53, %54 : vector<16x32xf32>
    %c0_24 = arith.constant 0 : index
    %c0_25 = arith.constant 0 : index
    %c0_26 = arith.constant 0 : index
    %56 = vector.load %arg8[%c0_24, %c0_25, %c0_26] : memref<1x16x32xf32, #tpu.memory_space<vmem>>, vector<1x16x32xf32>
    %57 = vector.shape_cast %56 : vector<1x16x32xf32> to vector<16x32xf32>
    %58 = arith.addf %55, %57 : vector<16x32xf32>
    %c0_27 = arith.constant 0 : index
    %c0_28 = arith.constant 0 : index
    %c0_29 = arith.constant 0 : index
    %59 = vector.load %arg9[%c0_27, %c0_28, %c0_29] : memref<1x16x32xf32, #tpu.memory_space<vmem>>, vector<1x16x32xf32>
    %60 = vector.shape_cast %59 : vector<1x16x32xf32> to vector<16x32xf32>
    %61 = vector.shape_cast %58 : vector<16x32xf32> to vector<1x16x32xf32>
    tpu.vector_store %arg9[%c0_27, %c0_28, %c0_29], %61 {strides = array<i32>} : memref<1x16x32xf32, #tpu.memory_space<vmem>>, vector<1x16x32xf32>,
    return
  }
  func.func @transform_0(%arg0: i32) -> (i32, i32, i32) {
    %c0_i32 = arith.constant 0 : i32
    %c0_i32_0 = arith.constant 0 : i32
    %c0_i32_1 = arith.constant 0 : i32
    return %arg0, %c0_i32, %c0_i32_0 : i32, i32, i32
  }
  func.func @transform_1(%arg0: i32) -> (i32, i32) {
    %c0_i32 = arith.constant 0 : i32
    %c0_i32_0 = arith.constant 0 : i32
    %c0_i32_1 = arith.constant 0 : i32
    return %c0_i32, %c0_i32_0 : i32, i32
  }
  func.func @transform_2(%arg0: i32) -> (i32, i32) {
    %c0_i32 = arith.constant 0 : i32
    %c0_i32_0 = arith.constant 0 : i32
    %c0_i32_1 = arith.constant 0 : i32
    return %c0_i32, %c0_i32_0 : i32, i32
  }
  func.func @transform_3(%arg0: i32) -> (i32, i32) {
    %c0_i32 = arith.constant 0 : i32
    %c0_i32_0 = arith.constant 0 : i32
    %c0_i32_1 = arith.constant 0 : i32
    return %c0_i32, %c0_i32_0 : i32, i32
  }
  func.func @transform_4(%arg0: i32) -> (i32, i32) {
    %c0_i32 = arith.constant 0 : i32
    %c0_i32_0 = arith.constant 0 : i32
    %c0_i32_1 = arith.constant 0 : i32
    return %c0_i32, %c0_i32_0 : i32, i32
  }
  func.func @transform_5(%arg0: i32) -> (i32, i32) {
    %c0_i32 = arith.constant 0 : i32
    %c0_i32_0 = arith.constant 0 : i32
    %c0_i32_1 = arith.constant 0 : i32
    return %c0_i32, %c0_i32_0 : i32, i32
  }
  func.func @transform_6(%arg0: i32) -> (i32, i32) {
    %c0_i32 = arith.constant 0 : i32
    %c0_i32_0 = arith.constant 0 : i32
    %c0_i32_1 = arith.constant 0 : i32
    return %c0_i32, %c0_i32_0 : i32, i32
  }
  func.func @transform_7(%arg0: i32) -> (i32, i32, i32) {
    %c0_i32 = arith.constant 0 : i32
    %c0_i32_0 = arith.constant 0 : i32
    %c0_i32_1 = arith.constant 0 : i32
    %c0_i32_2 = arith.constant 0 : i32
    return %c0_i32, %c0_i32_0, %c0_i32_1 : i32, i32, i32
  }
  func.func @transform_8(%arg0: i32) -> (i32, i32, i32) {
    %c0_i32 = arith.constant 0 : i32
    %c0_i32_0 = arith.constant 0 : i32
    %c0_i32_1 = arith.constant 0 : i32
    return %arg0, %c0_i32, %c0_i32_0 : i32, i32, i32
  }
}

</mosaic_0001>

<bundles_post_ra>
// kernel: tpu_custom_call.1
= control target key start
LH: loop header
LB: loop body
LE: loop exit
PB: predicated region body
PF: predicated region fallthrough
CT: control target
= control target key end

     0   :  { %13 = vsyncpa [#allocation3], 0  ;;  %s1672_s0 = inlined_call_operand.hbm [shape: f32[2,16,48], index: 0, kind: input, shape index: {}]   ;;  %s1673_s1 = inlined_call_operand.hbm [shape: f32[1,48], index: 1, kind: input, shape index: {}]   ;;  %s1674_s2 = inlined_call_operand.hbm [shape: f32[1,48], index: 2, kind: input, shape index: {}]   ;;  %s1675_s3 = inlined_call_operand.hbm [shape: bf16[48,32], index: 3, kind: input, shape index: {}]   ;;  %s1676_s4 = inlined_call_operand.hbm [shape: f32[1,32], index: 4, kind: input, shape index: {}]   ;;  %s1677_s5 = inlined_call_operand.hbm [shape: f32[1,32], index: 5, kind: input, shape index: {}]   ;;  %s1678_s6 = inlined_call_operand.hbm [shape: f32[1,32], index: 6, kind: input, shape index: {}]   ;;  %s1679_s7 = inlined_call_operand.hbm [shape: f32[1,16,32], index: 7, kind: input, shape index: {}]   ;;  %s1680_s8 = inlined_call_operand.hbm [shape: f32[2,16,32], index: 8, kind: output, shape index: {}]  }
   0x1   :  { %15 = vsyncpa [#allocation3 + $0x1], 0 }
   0x2   :  { %16 = vsyncpa [#allocation6], 0 }
   0x3   :  { %17 = vsyncpa [#allocation9], 0 }
   0x4   :  { %18 = vsyncpa [#allocation12], 0 }
   0x5   :  { %19 = vsyncpa [#allocation15], 0 }
   0x6   :  { %20 = vsyncpa [#allocation4], 0 }
   0x7   :  { %22 = vsyncpa [#allocation4 + $0x1], 0  ;;  %s1308_s27 = smov 0   ;;  %s1310_s28 = smov 0  }
   0x8   :  { %s1312_s29 = smov 0   ;;  %s1314_s30 = smov 0  }
   0x9 LB: > { %s1246_s9 = smov [#allocation5]   ;;  %s1329_s11 = sadd.s32 4294967295, %s1244_s30   ;;  %s1244_s30 = sphi %s1314_s30, %s1711_s30   ;;  %s1240_s29 = sphi %s1312_s29, %s1710_s29   ;;  %s1236_s28 = sphi %s1310_s28, %s1709_s28   ;;  %s1232_s27 = sphi %s1308_s27, %s1708_s27  }
   0xa   : > { %s245_s10 = sshll.u32 %s1246_s9, 4  ;;  %p748_p0 = scmp.ge.s32.totalorder %s1244_s30, 1  ;;  %s1334_s10 = int_to_ptr.vmem [resolvable:$true] %s245_s10 }
   0xb   : > { %p1681_p1 = scmp.eq.s32.totalorder %s1329_s11, 0  ;;  %p232_p2 = scmp.lt.s32.totalorder %s1244_s30, 3 }
   0xc   : > { %s1247_s13 = smov [#allocation8]   ;;  %s1248_s16 = smov [#allocation11]  }
   0xd   : > { %p1336_p3 = pnand %p748_p0, %p232_p2  ;;  %s266_s14 = sshll.u32 %s1247_s13, 4  ;;  %s1343_s14 = int_to_ptr.vmem [resolvable:$true] %s266_s14 }
   0xe   : > { %s291_s17 = sshll.u32 %s1248_s16, 4  ;;  %s936_s20 = scalar_lea.hbm %s1673_s1, 16  ;;  %s1351_s17 = int_to_ptr.vmem [resolvable:$true] %s291_s17 }
   0xf   : > { %s1686_s12 = scalar_select %p1336_p3, 1, 0 }
  0x10   : > { %p832_p5 = pneg %p1336_p3  ;;  %p937_p7 = scmp.ne.s32.totalorder %s1673_s1, %s936_s20 }
  0x11   : > { %p943_p11 = scmp.lt.u32.totalorder %s936_s20, %s1673_s1 }
  0x12   : > { %p1347_p6 = pnand %p832_p5, %p1681_p1 }
  0x14   : > { %p1361_p8 = pneg %p1347_p6 }
  0x16   : > { %p939_p9 = pnand %p1361_p8, %p937_p7 }
  0x18   : > { %p940_p10 = pneg %p939_p9 }
  0x1a   : > { %p945_p12 = pnand %p943_p11, %p940_p10 }
  0x1c   : > { %948 = shalt.err (!%p945_p12)
}
  0x1d   : > { %s949_s26 = scalar_lea.vmem %s1334_s10, 16  ;;  %s956_s9 = scalar_lea.vmem %s1334_s10, 32 }
  0x1e   : > { %p950_p13 = scmp.ne.s32.totalorder %s1334_s10, %s949_s26  ;;  %p957_p5 = scmp.lt.s32.totalorder %s1334_s10, %s1334_s10 }
  0x1f   : > { %p958_p7 = scmp.lt.s32.totalorder %s956_s9, %s949_s26 }
  0x20   : > { %p952_p0 = pnand %p950_p13, %p1361_p8 }
  0x21   : > { %p959_p9 = por %p958_p7, %p957_p5 }
  0x22   : > { %p953_p2 = pneg %p952_p0 }
  0x24   : > { %p960_p4 = pnand %p959_p9, %p953_p2 }
  0x26   : > { %963 = shalt.err (!%p960_p4)
}
  0x27   : > { %835 = dma.hbm_to_vmem [thread:$0]  (!%p1347_p6), %s1673_s1, 16, %s1334_s10, [#allocation6]  }
  0x28   : > { %s964_s20 = scalar_lea.hbm %s1675_s3, 384 }
  0x29   : > { %p965_p10 = scmp.ne.s32.totalorder %s1675_s3, %s964_s20  ;;  %p971_p4 = scmp.lt.u32.totalorder %s964_s20, %s1675_s3 }
  0x2b   : > { %p967_p11 = pnand %p965_p10, %p1361_p8 }
  0x2d   : > { %p968_p12 = pneg %p967_p11 }
  0x2f   : > { %p973_p13 = pnand %p971_p4, %p968_p12 }
  0x31   : > { %976 = shalt.err (!%p973_p13)
}
  0x32   : > { %s977_s10 = scalar_lea.vmem %s1343_s14, 384  ;;  %p985_p7 = scmp.lt.s32.totalorder %s1343_s14, %s1343_s14 }
  0x33   : > { %p978_p0 = scmp.ne.s32.totalorder %s1343_s14, %s977_s10  ;;  %p986_p9 = scmp.lt.s32.totalorder %s977_s10, %s977_s10 }
  0x35   : > { %p980_p2 = pnand %p978_p0, %p1361_p8  ;;  %p987_p10 = por %p986_p9, %p985_p7 }
  0x37   : > { %p981_p5 = pneg %p980_p2 }
  0x39   : > { %p988_p11 = pnand %p987_p10, %p981_p5 }
  0x3b   : > { %991 = shalt.err (!%p988_p11)
}
  0x3c   : > { %s1249_s26 = smov 64   ;;  %s1250_s9 = smov 4  }
  0x3d   : > { %841 = dma.hbm_to_vmem [thread:$0]  (!%p1347_p6), %s1675_s3, 384, %s1343_s14, [#allocation9], %s1249_s26, %s1249_s26, %s1250_s9  }
  0x3e   : > { %s992_s20 = scalar_lea.hbm %s1677_s5, 16 }
  0x3f   : > { %p993_p12 = scmp.ne.s32.totalorder %s1677_s5, %s992_s20  ;;  %p999_p0 = scmp.lt.u32.totalorder %s992_s20, %s1677_s5 }
  0x41   : > { %p995_p4 = pnand %p993_p12, %p1361_p8 }
  0x43   : > { %p996_p13 = pneg %p995_p4 }
  0x45   : > { %p1001_p2 = pnand %p999_p0, %p996_p13 }
  0x47   : > { %1004 = shalt.err (!%p1001_p2)
}
  0x48   : > { %s1005_s14 = scalar_lea.vmem %s1351_s17, 16  ;;  %s1012_s10 = scalar_lea.vmem %s1351_s17, 32 }
  0x49   : > { %p1006_p5 = scmp.ne.s32.totalorder %s1351_s17, %s1005_s14  ;;  %p1013_p10 = scmp.lt.s32.totalorder %s1351_s17, %s1351_s17 }
  0x4a   : > { %p1014_p11 = scmp.lt.s32.totalorder %s1012_s10, %s1005_s14 }
  0x4b   : > { %p1008_p7 = pnand %p1006_p5, %p1361_p8 }
  0x4c   : > { %p1015_p12 = por %p1014_p11, %p1013_p10 }
  0x4d   : > { %p1009_p9 = pneg %p1008_p7 }
  0x4f   : > { %p1016_p4 = pnand %p1015_p12, %p1009_p9 }
  0x51   : > { %1019 = shalt.err (!%p1016_p4)
}
  0x52   : > { %847 = dma.hbm_to_vmem [thread:$0]  (!%p1347_p6), %s1677_s5, 16, %s1351_s17, [#allocation12]  }
  0x53   : > { %s1251_s13 = smov [#allocation7]   ;;  %s1252_s18 = smov [#allocation10]  }
  0x54   : > { %s256_s16 = sshll.u32 %s1251_s13, 4  ;;  %s280_s19 = sshll.u32 %s1252_s18, 4  ;;  %s257_s16 = int_to_ptr.vmem [resolvable:$true] %s256_s16  ;;  %s281_s19 = int_to_ptr.vmem [resolvable:$true] %s280_s19 }
  0x55   : > { %s1020_s22 = scalar_lea.hbm %s1674_s2, 16 }
  0x56   : > { %p1021_p13 = scmp.ne.s32.totalorder %s1674_s2, %s1020_s22  ;;  %p1027_p5 = scmp.lt.u32.totalorder %s1020_s22, %s1674_s2 }
  0x58   : > { %p1023_p0 = pnand %p1021_p13, %p1361_p8 }
  0x5a   : > { %p1024_p2 = pneg %p1023_p0 }
  0x5c   : > { %p1029_p7 = pnand %p1027_p5, %p1024_p2 }
  0x5e   : > { %1032 = shalt.err (!%p1029_p7)
}
  0x5f   : > { %s1033_s17 = scalar_lea.vmem %s257_s16, 16  ;;  %s1040_s26 = scalar_lea.vmem %s257_s16, 32 }
  0x60   : > { %p1034_p9 = scmp.ne.s32.totalorder %s257_s16, %s1033_s17  ;;  %p1041_p12 = scmp.lt.s32.totalorder %s257_s16, %s257_s16 }
  0x61   : > { %p1042_p4 = scmp.lt.s32.totalorder %s1040_s26, %s1033_s17 }
  0x62   : > { %p1036_p10 = pnand %p1034_p9, %p1361_p8 }
  0x63   : > { %p1043_p1 = por %p1042_p4, %p1041_p12 }
  0x64   : > { %p1037_p11 = pneg %p1036_p10 }
  0x66   : > { %p1044_p3 = pnand %p1043_p1, %p1037_p11 }
  0x68   : > { %1047 = shalt.err (!%p1044_p3)
}
  0x69   : > { %838 = dma.hbm_to_vmem [thread:$0]  (!%p1347_p6), %s1674_s2, 16, %s257_s16, [#allocation6]  }
  0x6a   : > { %s1048_s21 = scalar_lea.hbm %s1676_s4, 16 }
  0x6b   : > { %p1049_p13 = scmp.ne.s32.totalorder %s1676_s4, %s1048_s21  ;;  %p1055_p3 = scmp.lt.u32.totalorder %s1048_s21, %s1676_s4 }
  0x6d   : > { %p1051_p0 = pnand %p1049_p13, %p1361_p8 }
  0x6f   : > { %p1052_p1 = pneg %p1051_p0 }
  0x71   : > { %p1057_p2 = pnand %p1055_p3, %p1052_p1 }
  0x73   : > { %1060 = shalt.err (!%p1057_p2)
}
  0x74   : > { %s1061_s10 = scalar_lea.vmem %s281_s19, 16  ;;  %s1068_s16 = scalar_lea.vmem %s281_s19, 32 }
  0x75   : > { %p1062_p5 = scmp.ne.s32.totalorder %s281_s19, %s1061_s10  ;;  %p1069_p10 = scmp.lt.s32.totalorder %s281_s19, %s281_s19 }
  0x76   : > { %p1070_p11 = scmp.lt.s32.totalorder %s1068_s16, %s1061_s10 }
  0x77   : > { %p1064_p7 = pnand %p1062_p5, %p1361_p8 }
  0x78   : > { %p1071_p12 = por %p1070_p11, %p1069_p10 }
  0x79   : > { %p1065_p9 = pneg %p1064_p7 }
  0x7b   : > { %p1072_p4 = pnand %p1071_p12, %p1065_p9 }
  0x7d   : > { %1075 = shalt.err (!%p1072_p4)
}
  0x7e   : > { %844 = dma.hbm_to_vmem [thread:$0]  (!%p1347_p6), %s1676_s4, 16, %s281_s19, [#allocation9]  }
  0x7f   : > { %s1253_s9 = smov [#allocation13]   ;;  %s1254_s18 = smov [#allocation14]  }
  0x80   : > { %s302_s13 = sshll.u32 %s1253_s9, 4  ;;  %s312_s20 = sshll.u32 %s1254_s18, 4  ;;  %s303_s13 = int_to_ptr.vmem [resolvable:$true] %s302_s13  ;;  %s313_s20 = int_to_ptr.vmem [resolvable:$true] %s312_s20 }
  0x81   : > { %s1076_s24 = scalar_lea.hbm %s1678_s6, 16 }
  0x82   : > { %p1077_p13 = scmp.ne.s32.totalorder %s1678_s6, %s1076_s24  ;;  %p1083_p3 = scmp.lt.u32.totalorder %s1076_s24, %s1678_s6 }
  0x84   : > { %p1079_p0 = pnand %p1077_p13, %p1361_p8 }
  0x86   : > { %p1080_p1 = pneg %p1079_p0 }
  0x88   : > { %p1085_p2 = pnand %p1083_p3, %p1080_p1 }
  0x8a   : > { %1088 = shalt.err (!%p1085_p2)
}
  0x8b   : > { %s1089_s19 = scalar_lea.vmem %s303_s13, 16  ;;  %s1096_s17 = scalar_lea.vmem %s303_s13, 32 }
  0x8c   : > { %p1090_p5 = scmp.ne.s32.totalorder %s303_s13, %s1089_s19  ;;  %p1097_p10 = scmp.lt.s32.totalorder %s303_s13, %s303_s13 }
  0x8d   : > { %p1098_p11 = scmp.lt.s32.totalorder %s1096_s17, %s1089_s19 }
  0x8e   : > { %p1092_p7 = pnand %p1090_p5, %p1361_p8 }
  0x8f   : > { %p1099_p12 = por %p1098_p11, %p1097_p10 }
  0x90   : > { %p1093_p9 = pneg %p1092_p7 }
  0x92   : > { %p1100_p4 = pnand %p1099_p12, %p1093_p9 }
  0x94   : > { %1103 = shalt.err (!%p1100_p4)
}
  0x95   : > { %850 = dma.hbm_to_vmem [thread:$0]  (!%p1347_p6), %s1678_s6, 16, %s303_s13, [#allocation12]  }
  0x96   : > { %s1104_s22 = scalar_lea.hbm %s1679_s7, 256 }
  0x97   : > { %p1105_p13 = scmp.ne.s32.totalorder %s1679_s7, %s1104_s22  ;;  %p1111_p3 = scmp.lt.u32.totalorder %s1104_s22, %s1679_s7 }
  0x99   : > { %p1107_p0 = pnand %p1105_p13, %p1361_p8 }
  0x9b   : > { %p1108_p1 = pneg %p1107_p0 }
  0x9d   : > { %p1113_p2 = pnand %p1111_p3, %p1108_p1 }
  0x9f   : > { %1116 = shalt.err (!%p1113_p2)
}
  0xa0   : > { %s1117_s16 = scalar_lea.vmem %s313_s20, 256  ;;  %p1125_p10 = scmp.lt.s32.totalorder %s313_s20, %s313_s20 }
  0xa1   : > { %p1118_p5 = scmp.ne.s32.totalorder %s313_s20, %s1117_s16  ;;  %p1126_p11 = scmp.lt.s32.totalorder %s1117_s16, %s1117_s16 }
  0xa3   : > { %p1120_p7 = pnand %p1118_p5, %p1361_p8  ;;  %p1127_p12 = por %p1126_p11, %p1125_p10 }
  0xa5   : > { %p1121_p9 = pneg %p1120_p7 }
  0xa7   : > { %p1128_p4 = pnand %p1127_p12, %p1121_p9 }
  0xa9   : > { %1131 = shalt.err (!%p1128_p4)
}
  0xaa   : > { %s1683_s13 = smov 128   ;;  %s1684_s23 = smov 8  }
  0xab   : > { %853 = dma.hbm_to_vmem [thread:$0]  (!%p1347_p6), %s1679_s7, 256, %s313_s20, [#allocation15], %s1683_s13, %s1683_s13, %s1684_s23  }
  0xac   : > { %s747_s26 = sadd.s32 4294967294, %s1244_s30   ;;  %s1507_s9 = sadd.s32 1, %s1244_s30  }
  0xad   : > { %s35_s18 = sadd.s32 1, %s1240_s29  ;;  %s32_s21 = ssub.s32 %s1244_s30, %s1507_s9 }
  0xae   : > { %p42_p8 = scmp.ne.s32.totalorder %s1240_s29, %s1236_s28  ;;  %p33_p13 = scmp.eq.s32.totalorder %s32_s21, 0 }
  0xaf   : > { %p43_p0 = scmp.eq.s32.totalorder %s1244_s30, 0  ;;  %p48_p1 = scmp.ne.s32.totalorder %s1236_s28, %s1232_s27 }
  0xb0   : > { %p219_p3 = scmp.eq.s32.totalorder %s1329_s11, 1  ;;  %p1689_p5 = scmp.eq.s32.totalorder %s1329_s11, 0 }
  0xb1   : > { %s1519_s15 = scalar_select %p33_p13, %s1240_s29, %s35_s18  }
  0xb2   : > { %p44_p2 = por %p43_p0, %p42_p8  ;;  %p1523_p7 = por %p1689_p5, %p48_p1 }
  0xb3   : > { %p1527_p6 = por %p219_p3, %p42_p8  ;;  %p225_p9 = scmp.eq.s32.totalorder %s747_s26, 1 }
  0xb4   : > { %p869_p10 = scmp.lt.s32.totalorder %s1244_s30, 2  ;;  %s326_s24 = sand.u32 1, %s1240_s29  }
  0xb5   : > { %s1691_s20 = scalar_select %p1527_p6, 1, 0 }
  0xb6   : > { %p1533_p11 = por %p225_p9, %p48_p1  ;;  %s757_s14 = sshll.u32 %s326_s24, 4 }
  0xb7   : > { %s784_s10 = sshll.u32 %s1244_s30, 8  ;;  %s330_s18 = scalar_lea.vmem [#allocation2], %s757_s14 }
  0xb8   : > { %s1692_s25 = scalar_select %p1533_p11, 1, 0 }
  0xb9   : > { %s1541_s17 = scalar_lea.hbm %s1672_s0, %s784_s10  ;;  %s337_s21 = sshll.u32 %s330_s18, 4  ;;  %s1547_s21 = int_to_ptr.vmem [resolvable:$true] %s337_s21 }
  0xba   : > { %p1543_p12 = pnand %p869_p10, %p44_p2  ;;  %s1549_s13 = scalar_lea.sflag [#allocation3], %s326_s24 }
  0xbb   : > { %s1132_s23 = scalar_lea.hbm %s1541_s17, 256  ;;  %s1137_s16 = scalar_lea.hbm %s1672_s0, 512 }
  0xbc   : > { %p1133_p4 = scmp.ne.s32.totalorder %s1541_s17, %s1132_s23  ;;  %p1134_p8 = pneg %p1543_p12 }
  0xbd   : > { %p1138_p1 = scmp.lt.u32.totalorder %s1541_s17, %s1672_s0  ;;  %p1139_p3 = scmp.lt.u32.totalorder %s1137_s16, %s1132_s23 }
  0xbe   : > { %p1135_p13 = pnand %p1134_p8, %p1133_p4  ;;  %p1141_p5 = scmp.lt.u32.totalorder %s1132_s23, %s1541_s17 }
  0xbf   : > { %p1140_p2 = por %p1139_p3, %p1138_p1 }
  0xc0   : > { %p1136_p0 = pneg %p1135_p13 }
  0xc1   : > { %p1142_p9 = por %p1141_p5, %p1140_p2 }
  0xc3   : > { %p1143_p10 = pnand %p1142_p9, %p1136_p0 }
  0xc5   : > { %1146 = shalt.err (!%p1143_p10)
}
  0xc6   : > { %s1147_s24 = scalar_lea.vmem %s1547_s21, 256  ;;  %s1257_s14 = smov [#allocation2]  }
  0xc7   : > { %p1148_p4 = scmp.ne.s32.totalorder %s1547_s21, %s1147_s24  ;;  %s1152_s10 = sshll.u32 %s1257_s14, 4  ;;  %s1153_s10 = int_to_ptr.vmem [resolvable:$false] %s1152_s10 }
  0xc8   : > { %s1154_s19 = scalar_lea.vmem %s1153_s10, 512  ;;  %p1155_p6 = scmp.lt.s32.totalorder %s1547_s21, %s1153_s10 }
  0xc9   : > { %p1150_p13 = pnand %p1148_p4, %p1134_p8  ;;  %p1156_p1 = scmp.lt.s32.totalorder %s1154_s19, %s1147_s24 }
  0xcb   : > { %p1151_p11 = pneg %p1150_p13  ;;  %p1157_p3 = por %p1156_p1, %p1155_p6 }
  0xcd   : > { %p1158_p2 = pnand %p1157_p3, %p1151_p11 }
  0xcf   : > { %1161 = shalt.err (!%p1158_p2)
}
  0xd0   : > { %s1694_s23 = smov 8   ;;  %s1695_s16 = smov 128  }
  0xd1   : > { %857 = dma.hbm_to_vmem [thread:$0]  (!%p1543_p12), %s1541_s17, 256, %s1547_s21, %s1549_s13, %s1695_s16, %s1695_s16, %s1694_s23  }
  0xd2   : > { %p1696_p8 = scmp.ne.s32.totalorder %s1686_s12, 0 }
  0xd3   : > { %s1583_s18 = sand.u32 (!%p1696_p8), 1, %s1236_s28  }
  0xd4   : > { %349 = sbr.rel (%p1696_p8) target bundleno = 1099 (0x44b), region = 52  ;;  %s761_s24 = sshll.u32 (!%p1696_p8), %s1583_s18, 4 }
  0xd5   : > { %s352_s14 = scalar_lea.sflag (!%p1696_p8), [#allocation3], %s1583_s18  ;;  %s355_s26 = scalar_lea.vmem (!%p1696_p8), [#allocation2], %s761_s24 }
  0xdb   : > { %1207 = dma.done.wait (%p1523_p7), %s352_s14, 256  }
  0xdc   : > { %1209 = vsyncadd (%p1523_p7), %s352_s14, 4294967040  ;;  %p1697_p6 = scmp.eq.s32.totalorder %s1329_s11, 0 }
  0xde   : > { %1211 = dma.done.wait (%p1697_p6), [#allocation6], 32   ;;  %p1698_p11 = pmov %p1697_p6 }
  0xdf   : > { %p1699_p12 = pmov %p1697_p6 }
  0xe0   : > { %1213 = vsyncadd (%p1698_p11), [#allocation6], 4294967264 }
  0xe1   : > { %1215 = dma.done.wait (%p1699_p12), [#allocation9], 400   ;;  %p1700_p0 = pmov %p1697_p6 }
  0xe3   : > { %1217 = vsyncadd (%p1700_p0), [#allocation9], 4294966896  ;;  %p1701_p5 = pmov %p1700_p0 }
  0xe4   : > { %p1702_p9 = pmov %p1700_p0 }
  0xe5   : > { %1219 = dma.done.wait (%p1701_p5), [#allocation12], 32  }
  0xe6   : > { %1221 = vsyncadd (%p1702_p9), [#allocation12], 4294967264  ;;  %p1703_p7 = pmov %p1700_p0 }
  0xe7   : > { %p1704_p10 = pmov %p1700_p0 }
  0xe8   : > { %1223 = dma.done.wait (%p1703_p7), [#allocation15], 256  }
  0xe9   : > { %1225 = vsyncadd (%p1704_p10), [#allocation15], 4294967040  ;;  %vm421_vm0 = vcmask 392192   ;;  %v417_v0 = vld [vmem:[%s355_s26] sm:$0xff]  ;;  %v418_v1 = vld [vmem:[%s355_s26 + $0x8] sm:$0xff]  ;;  %v1258_v15 = vmov 0.0  }
  0xea   : > { %v422_v2 = vsel %vm421_vm0, %v417_v0, 0.0  ;;  %v425_v3 = vsel %vm421_vm0, %v418_v1, 0.0  ;;  %v925_v14 = vld [vmem:[#allocation8] sm:$0xff]   ;;  %790 = vmatprep.subr.bf16.mxu0 %v1258_v15  ;;  %v926_v16 = vld [vmem:[#allocation8 + $0x8] sm:$0xff]   ;;  %v927_v17 = vld [vmem:[#allocation8 + $0x10] sm:$0xff]   ;;  %vm1259_vm1 = vmmov 0  }
  0xeb   : > { %423 = vadd.xlane.f32.xlu0 %v422_v2  ;;  %791 = vmatpush3.bf16.msra.mxu0 %v925_v14  ;;  %v770_v26 = vld [vmem:[#allocation5] ss:$0 sm:$0xff]  ;;  %v771_v30 = vld [vmem:[#allocation7] ss:$0 sm:$0xff]  ;;  %v772_v35 = vld [vmem:[#allocation10] ss:$0 sm:$0xff] }
  0xec   : > { %792 = vmatprep.subr.bf16.mxu0 %v1258_v15  ;;  %796 = vmatprep.mubr.msk.bf16.mxu0 %vm1259_vm1, %v1258_v15  ;;  %vm543_vm2 = vcmask 261120   ;;  %v777_v61 = vld [vmem:[#allocation11] ss:$0 sm:$0xff]  ;;  %s785_s12 = sshll.u32 %s1329_s11, 8  ;;  %s415_s13 = scalar_lea.vmem [#allocation16], %s761_s24 }
  0xed   : > { %s607_s22 = sshll.u32 %s415_s13, 4  ;;  %s1624_s10 = scalar_lea.hbm %s1680_s8, %s785_s12  ;;  %s1626_s22 = int_to_ptr.vmem [resolvable:$true] %s607_s22 }
  0xee   : > { %s594_s11 = scalar_lea.sflag [#allocation4], %s1583_s18  ;;  %s1162_s19 = scalar_lea.vmem %s1626_s22, 256 }
  0xef   : > { %426 = vadd.xlane.f32.xlu0 %v425_v3  ;;  %793 = vmatpush3.bf16.msra.mxu0 %v926_v16  ;;  %v587_v3 = vld [vmem:[#allocation14] sm:$0xff]  ;;  %p1163_p4 = scmp.ne.s32.totalorder %s1626_s22, %s1162_s19  ;;  %p1705_p13 = scmp.ne.s32.totalorder %s1691_s20, 0 }
  0xf0   : > { %794 = vmatprep.subr.bf16.mxu0 %v1258_v15  ;;  %s1260_s23 = smov [#allocation16]  }
  0xf1   : > { %p1164_p1 = pnand %p1163_p4, %p1705_p13  ;;  %s1166_s16 = sshll.u32 %s1260_s23, 4  ;;  %s1167_s16 = int_to_ptr.vmem [resolvable:$false] %s1166_s16 }
  0xf2   : > { %s1168_s24 = scalar_lea.vmem %s1167_s16, 512  ;;  %p1169_p2 = scmp.lt.s32.totalorder %s1626_s22, %s1167_s16 }
  0xf3   : > { %795 = vmatpush3.bf16.msra.mxu0 %v927_v17  ;;  %p1165_p3 = pneg %p1164_p1  ;;  %p1170_p8 = scmp.lt.s32.totalorder %s1168_s24, %s1162_s19 }
  0xf5   : > { %p1171_p6 = por %p1170_p8, %p1169_p2 }
  0xf7   : > { %p1172_p11 = pnand %p1171_p6, %p1165_p3 }
 0x178   : > { %v424_v4 = vpop.xlane.xlu0 %423 }
 0x179   : > { %v429_v5 = vmul.f32 0.020833334, %v424_v4 }
 0x17b   : > { %v431_v6 = vsub.f32 %v417_v0, %v429_v5  ;;  %v778_v0 = vld [vmem:[#allocation13] ss:$0 sm:$0xff] }
 0x17c   : > { %v427_v7 = vpop.xlane.xlu0 %426 }
 0x17d   : > { %v430_v8 = vmul.f32 0.020833334, %v427_v7  ;;  %v433_v9 = vmul.f32 %v431_v6, %v431_v6 }
 0x17f   : > { %v432_v10 = vsub.f32 %v418_v1, %v430_v8  ;;  %v435_v11 = vsel %vm421_vm0, %v433_v9, 0.0 }
 0x180   : > { %436 = vadd.xlane.f32.xlu1 %v435_v11 }
 0x181   : > { %v434_v12 = vmul.f32 %v432_v10, %v432_v10 }
 0x183   : > { %v438_v13 = vsel %vm421_vm0, %v434_v12, 0.0 }
 0x184   : > { %439 = vadd.xlane.f32.xlu1 %v438_v13 }
 0x20d   : > { %v437_v18 = vpop.xlane.xlu1 %436 }
 0x20e   : > { %v441_v19 = vmul.f32 0.020833334, %v437_v18 }
 0x210   : > { %v443_v20 = vadd.f32 1e-05, %v441_v19 }
 0x211   : > { %v440_v21 = vpop.xlane.xlu1 %439 }
 0x212   : > { %928 = vrsqrt.f32 %v443_v20  ;;  %v442_v22 = vmul.f32 0.020833334, %v440_v21 }
 0x214   : > { %v444_v23 = vadd.f32 1e-05, %v442_v22 }
 0x216   : > { %930 = vrsqrt.f32 %v444_v23 }
 0x21c   : > { %v929_v24 = vpop.eup %928 }
 0x21d   : > { %v447_v25 = vmul.f32 %v929_v24, %v431_v6  ;;  %v588_v6 = vld [vmem:[#allocation14 + $0x8] sm:$0xff] }
 0x21f   : > { %v455_v29 = vmul.f32 %v770_v26, %v447_v25 }
 0x220   : > { %v931_v27 = vpop.eup %930 }
 0x221   : > { %v448_v28 = vmul.f32 %v931_v27, %v432_v10  ;;  %v463_v32 = vadd.f32 %v771_v30, %v455_v29 }
 0x223   : > { %v456_v31 = vmul.f32 %v770_v26, %v448_v28 }
 0x225   : > { %v464_v33 = vadd.f32 %v771_v30, %v456_v31 }
 0x227   : > { %v471_v34 = vpack.c.bf16 %v464_v33, %v463_v32 }
 0x229   : > { %797 = vmatmul.mubr.msk.bf16.vlgmr.msra.gmra.mrb[0].mxu0 %vm421_vm0, %v471_v34 }
 0x2fc   : > { %v534_v36 = vpop.f32.mrb[0].mxu0 }
 0x2fd   : > { %v535_v37 = vadd.f32 %v772_v35, %v534_v36  ;;  %v798_v38 = vpop.f32.mrb[1].mxu0 }
 0x2fe   : > { %v537_v39 = vpop.f32.mrb[2].mxu0 }
 0x2ff   : > { %v538_v40 = vadd.f32 %v772_v35, %v537_v39  ;;  %v799_v41 = vpop.f32.mrb[3].mxu0  ;;  %v544_v42 = vsel %vm543_vm2, %v535_v37, 0.0 }
 0x300   : > { %545 = vadd.xlane.f32.xlu0 %v544_v42 }
 0x301   : > { %v547_v43 = vsel %vm543_vm2, %v538_v40, 0.0 }
 0x302   : > { %548 = vadd.xlane.f32.xlu1 %v547_v43 }
 0x38d   : > { %v546_v44 = vpop.xlane.xlu0 %545 }
 0x38e   : > { %v551_v45 = vmul.f32 0.03125, %v546_v44 }
 0x38f   : > { %v549_v46 = vpop.xlane.xlu1 %548 }
 0x390   : > { %v553_v47 = vsub.f32 %v535_v37, %v551_v45  ;;  %v552_v48 = vmul.f32 0.03125, %v549_v46 }
 0x392   : > { %v554_v49 = vsub.f32 %v538_v40, %v552_v48  ;;  %v555_v50 = vmul.f32 %v553_v47, %v553_v47 }
 0x394   : > { %v557_v51 = vsel %vm543_vm2, %v555_v50, 0.0  ;;  %v556_v52 = vmul.f32 %v554_v49, %v554_v49 }
 0x395   : > { %558 = vadd.xlane.f32.xlu0 %v557_v51 }
 0x396   : > { %v560_v53 = vsel %vm543_vm2, %v556_v52, 0.0 }
 0x397   : > { %561 = vadd.xlane.f32.xlu1 %v560_v53 }
 0x422   : > { %v559_v54 = vpop.xlane.xlu0 %558 }
 0x423   : > { %v563_v55 = vmul.f32 0.03125, %v559_v54 }
 0x424   : > { %v562_v56 = vpop.xlane.xlu1 %561 }
 0x425   : > { %v565_v57 = vadd.f32 1e-05, %v563_v55  ;;  %v564_v58 = vmul.f32 0.03125, %v562_v56 }
 0x427   : > { %932 = vrsqrt.f32 %v565_v57  ;;  %v566_v59 = vadd.f32 1e-05, %v564_v58 }
 0x429   : > { %934 = vrsqrt.f32 %v566_v59 }
 0x431   : > { %v933_v60 = vpop.eup %932 }
 0x432   : > { %v569_v62 = vmul.f32 %v933_v60, %v553_v47 }
 0x433   : > { %v935_v63 = vpop.eup %934 }
 0x434   : > { %v577_v1 = vmul.f32 %v777_v61, %v569_v62  ;;  %v570_v2 = vmul.f32 %v935_v63, %v554_v49 }
 0x436   : > { %v585_v4 = vadd.f32 %v778_v0, %v577_v1  ;;  %v578_v5 = vmul.f32 %v777_v61, %v570_v2 }
 0x438   : > { %v589_v7 = vadd.f32 %v587_v3, %v585_v4  ;;  %v586_v8 = vadd.f32 %v778_v0, %v578_v5 }
 0x43a   : > { %v590_v9 = vadd.f32 %v588_v6, %v586_v8  ;;  %591 = vst.msk [vmem:[%s415_s13] sm:$0xff] %vm543_vm2, %v589_v7 }
 0x43c   : > { %592 = vst.msk [vmem:[%s415_s13 + $0x8] sm:$0xff] %vm543_vm2, %v590_v9 }
 0x43d   : > { %1175 = shalt.err (!%p1172_p11)
}
 0x43e   : > { %s1176_s14 = scalar_lea.hbm %s1624_s10, 256  ;;  %s1180_s13 = scalar_lea.hbm %s1680_s8, 512 }
 0x43f   : > { %p1177_p12 = scmp.ne.s32.totalorder %s1624_s10, %s1176_s14  ;;  %p1181_p9 = scmp.lt.u32.totalorder %s1624_s10, %s1680_s8 }
 0x440   : > { %p1182_p7 = scmp.lt.u32.totalorder %s1180_s13, %s1176_s14  ;;  %p1184_p4 = scmp.lt.u32.totalorder %s1176_s14, %s1624_s10 }
 0x441   : > { %p1178_p0 = pnand %p1177_p12, %p1705_p13 }
 0x442   : > { %p1183_p10 = por %p1182_p7, %p1181_p9 }
 0x443   : > { %p1179_p5 = pneg %p1178_p0 }
 0x444   : > { %p1185_p1 = por %p1184_p4, %p1183_p10 }
 0x446   : > { %p1186_p3 = pnand %p1185_p1, %p1179_p5 }
 0x448   : > { %1189 = shalt.err (!%p1186_p3)
}
 0x449   : > { %s1261_s19 = smov 128   ;;  %s1262_s23 = smov 8  }
 0x44a   : > { %830 = dma.vmem_to_hbm [thread:$0]  (%p1705_p13), %s1626_s22, 256, %s1624_s10, %s594_s11, %s1261_s19, %s1261_s19, %s1262_s23  }
 0x44b PF: > { %s622_s16 = sand.u32 1, %s1232_s27   ;;  %p1706_p2 = scmp.ne.s32.totalorder %s1692_s25, 0 }
 0x44c   : > { %p1707_p8 = scmp.ge.s32.totalorder %s1244_s30, 2  ;;  %s623_s24 = scalar_lea.sflag [#allocation4], %s622_s16 }
 0x44e   : > { %p859_p6 = pnand %p1707_p8, %p1706_p2 }
 0x450   : > { %1227 = dma.done.wait (!%p859_p6), %s623_s24, 256  }
 0x451   : > { %1229 = vsyncadd (!%p859_p6), %s623_s24, 4294967040  ;;  %p25_p11 = scmp.ge.s32.totalorder %s1507_s9, 4   ;;  %s1708_s27 = smov %s1236_s28 }
 0x452   : > { %s1709_s28 = smov %s1240_s29  ;;  %s1710_s29 = smov %s1519_s15 }
 0x453   : > { %s1711_s30 = smov %s1507_s9  ;;  %27 = sbr.rel (!%p25_p11) target bundleno = 9 (0x9), region = 125 }
 0x45a   :  { %628 = vsyncpa [#allocation3], 1 }
 0x45b   :  { %630 = vsyncpa [#allocation3 + $0x1], 1 }
 0x45c   :  { %631 = vsyncpa [#allocation6], 1 }
 0x45d   :  { %632 = vsyncpa [#allocation9], 1 }
 0x45e   :  { %633 = vsyncpa [#allocation12], 1 }
 0x45f   :  { %634 = vsyncpa [#allocation15], 1 }
 0x460   :  { %635 = vsyncpa [#allocation4], 1 }
 0x461   :  { %637 = vsyncpa [#allocation4 + $0x1], 1 }

</bundles_post_ra>
